<compile_context>
chip_gen: v7x
topology: tpu7x:2x2x1
jax: 0.10.0
libtpu: 0.0.40
codegen_flags: <defaults>
</compile_context>

<pallas_src>
import functools

import jax
import jax.numpy as jnp
from jax.experimental import pallas as pl
from jax.experimental.pallas import tpu as pltpu


_LANE = 128                         # feature dims & N padded to multiples of this
_STRIPE_A_BYTES = 2 * 1024 * 1024   # max int8 A row-stripe per grid step
_KTILED_A_BYTES = 1 * 1024 * 1024   # max int8 A (TM, TK) tile (large-graph path)


def _round_up(x, m):
    return (x + m - 1) // m * m


def _pad2(a, rows, cols):
    r, c = a.shape
    return jnp.pad(a, ((0, rows - r), (0, cols - c)))


def _pick_tile(n, candidates):
    for c in candidates:
        if c <= n and n % c == 0:
            return c
    return n


# ---------------------------------------------------------------------------
# Kernel bodies
# ---------------------------------------------------------------------------
def _linear_kernel(x_ref, w_ref, b_ref, o_ref, *, apply_relu):
    # H = X @ W + b  (per-node dense linear of GCNConv_dgl / proj layers)
    y = jnp.dot(x_ref[...], w_ref[...], preferred_element_type=jnp.float32)
    y = y + b_ref[...]
    if apply_relu:
        y = jnp.maximum(y, 0.0)
    o_ref[...] = y.astype(o_ref.dtype)


def _spmm_stripe_kernel(a_ref, s_ref, h_ref, o_ref, *, apply_relu):
    # Y = dequant(A) @ H over a full row stripe; H fully VMEM-resident.
    a = a_ref[...].astype(jnp.bfloat16)          # exact: |int8| <= 127 fits bf16
    y = jnp.dot(a, h_ref[...], preferred_element_type=jnp.float32)
    y = y * s_ref[...]                           # per-row dequantization scale
    if apply_relu:
        y = jnp.maximum(y, 0.0)
    o_ref[...] = y.astype(o_ref.dtype)


def _spmm_ktiled_kernel(a_ref, s_ref, h_ref, o_ref, acc_ref, *, tk, apply_relu):
    # Large-graph path: A tiled over (row blocks, k blocks), f32 accumulator,
    # H fully VMEM-resident (constant block index) and sliced with pl.ds.
    k = pl.program_id(1)

    @pl.when(k == 0)
    def _():
        acc_ref[...] = jnp.zeros_like(acc_ref)

    a = a_ref[...].astype(jnp.bfloat16)
    start = pl.multiple_of(k * tk, tk)
    acc_ref[...] += jnp.dot(a, h_ref[pl.ds(start, tk), :],
                            preferred_element_type=jnp.float32)

    @pl.when(k == pl.num_programs(1) - 1)
    def _():
        y = acc_ref[...] * s_ref[...]
        if apply_relu:
            y = jnp.maximum(y, 0.0)
        o_ref[...] = y.astype(o_ref.dtype)


def _proj_kernel(x_ref, w1_ref, b1_ref, w2_ref, b2_ref, o_ref):
    # proj_head: Linear -> ReLU -> Linear, fused (intermediate stays on-chip)
    h = jnp.dot(x_ref[...], w1_ref[...], preferred_element_type=jnp.float32)
    h = jnp.maximum(h + b1_ref[...], 0.0)
    z = jnp.dot(h, w2_ref[...], preferred_element_type=jnp.float32)
    o_ref[...] = (z + b2_ref[...]).astype(o_ref.dtype)


# ---------------------------------------------------------------------------
# pallas_call wrappers
# ---------------------------------------------------------------------------
def linear(x, w, b2d, *, apply_relu=False, out_dtype=jnp.bfloat16):
    """y = [relu](x @ w + b), row-tiled, lane-dense output (bf16 operands)."""
    n, f_in = x.shape
    f_out = w.shape[1]
    tm = _pick_tile(n, (512, 256, 128))
    cost = pl.CostEstimate(
        flops=2 * n * f_in * f_out,
        transcendentals=0,
        bytes_accessed=(n * f_in * x.dtype.itemsize
                        + f_in * f_out * w.dtype.itemsize
                        + f_out * 4
                        + n * f_out * jnp.dtype(out_dtype).itemsize),
    )
    return pl.pallas_call(
        functools.partial(_linear_kernel, apply_relu=apply_relu),
        out_shape=jax.ShapeDtypeStruct((n, f_out), out_dtype),
        grid_spec=pltpu.PrefetchScalarGridSpec(
            num_scalar_prefetch=0,
            grid=(n // tm,),
            in_specs=[
                pl.BlockSpec((tm, f_in), lambda i: (i, 0)),
                pl.BlockSpec((f_in, f_out), lambda i: (0, 0)),
                pl.BlockSpec((1, f_out), lambda i: (0, 0)),
            ],
            out_specs=pl.BlockSpec((tm, f_out), lambda i: (i, 0)),
        ),
        compiler_params=pltpu.CompilerParams(
            dimension_semantics=("parallel",)),
        cost_estimate=cost,
    )(x, w, b2d)


def quantize_adj(adj, n_pad):
    """Per-row symmetric int8 quantization + zero padding of the adjacency.

    Returns (q int8 (n_pad, n_pad), row_scale f32 (n_pad, 1)).
    Invariant relied upon downstream: padded rows/columns of q are exactly
    zero, so padded "ghost" nodes (whose linear output equals the bias) never
    contaminate real rows of A @ H.
    """
    s = jnp.max(jnp.abs(adj), axis=1, keepdims=True)
    s = jnp.where(s > 0, s, 1.0).astype(jnp.float32)
    q = jnp.clip(jnp.round(adj / s * 127.0), -127, 127).astype(jnp.int8)
    q = _pad2(q, n_pad, n_pad)                      # int8 pad: no f32 copy of A
    scale = jnp.pad(s / 127.0, ((0, n_pad - s.shape[0]), (0, 0)))
    return q, scale


def spmm(adj_q, row_scale, h, *, apply_relu, out_dtype=jnp.float32,
         force_ktiled=False):
    """y = [relu](dequant(A) @ H): int8-streamed A, resident H, f32 accum."""
    n = adj_q.shape[0]
    f_out = h.shape[1]
    h_bytes = n * f_out * h.dtype.itemsize

    cost = pl.CostEstimate(
        flops=2 * n * n * f_out,
        transcendentals=0,
        bytes_accessed=(n * n                                # A int8
                        + n * 4                              # per-row scales
                        + h_bytes                            # H loaded once
                        + n * f_out * jnp.dtype(out_dtype).itemsize),
    )

    # Row stripe sizing for the small/medium-graph path.
    stripe_tm = _pick_tile(n, (1024, 512, 256, 128))
    while stripe_tm > 128 and stripe_tm * n > _STRIPE_A_BYTES:
        stripe_tm //= 2
    if stripe_tm == n and n >= 256:
        stripe_tm //= 2          # keep >=2 row blocks so v7x's 2 TCs can split

    use_stripe = (not force_ktiled) and stripe_tm * n <= _STRIPE_A_BYTES

    if use_stripe:
        tm = stripe_tm
        grid = (n // tm,)
        in_specs = [
            pl.BlockSpec((tm, n), lambda i: (i, 0)),          # A row stripe
            pl.BlockSpec((tm, 1), lambda i: (i, 0)),          # per-row scales
            pl.BlockSpec((n, f_out), lambda i: (0, 0)),       # H resident
        ]
        out_specs = pl.BlockSpec((tm, f_out), lambda i: (i, 0))
        scratch = []
        kernel = functools.partial(_spmm_stripe_kernel, apply_relu=apply_relu)
        sem = ("parallel",)
        vmem_need = (2 * tm * n            # int8 stripe, double-buffered
                     + tm * n * 2          # bf16 dequantized copy
                     + 2 * h_bytes
                     + 2 * tm * f_out * 4
                     + 2 * tm * 4)
    else:
        tm = _pick_tile(n, (512, 256, 128))
        tk = _pick_tile(n, (2048, 1024, 512, 256, 128))
        while tk > 128 and tm * tk > _KTILED_A_BYTES:
            tk //= 2
        grid = (n // tm, n // tk)
        in_specs = [
            pl.BlockSpec((tm, tk), lambda i, k: (i, k)),      # A tile
            pl.BlockSpec((tm, 1), lambda i, k: (i, 0)),       # per-row scales
            pl.BlockSpec((n, f_out), lambda i, k: (0, 0)),    # H resident (once)
        ]
        out_specs = pl.BlockSpec((tm, f_out), lambda i, k: (i, 0))
        scratch = [pltpu.VMEM((tm, f_out), jnp.float32)]
        kernel = functools.partial(_spmm_ktiled_kernel, tk=tk,
                                   apply_relu=apply_relu)
        sem = ("parallel", "arbitrary")
        vmem_need = (2 * tm * tk + tm * tk * 2 + 2 * h_bytes
                     + 3 * tm * f_out * 4 + 2 * tm * 4)

    # Raise the scoped-VMEM limit when needed; keep below v7x's 64 MiB VMEM.
    vmem_limit = int(min(max(vmem_need + (8 << 20), 32 << 20), 48 << 20))

    return pl.pallas_call(
        kernel,
        out_shape=jax.ShapeDtypeStruct((n, f_out), out_dtype),
        grid_spec=pltpu.PrefetchScalarGridSpec(
            num_scalar_prefetch=0,
            grid=grid,
            in_specs=in_specs,
            out_specs=out_specs,
            scratch_shapes=scratch,
        ),
        compiler_params=pltpu.CompilerParams(
            dimension_semantics=sem,
            vmem_limit_bytes=vmem_limit),
        cost_estimate=cost,
    )(adj_q, row_scale, h)


def proj_head(x, w1, b1, w2, b2, *, out_dtype=jnp.float32):
    """z = relu(x @ w1 + b1) @ w2 + b2, fused, row-tiled."""
    n, e_pad = x.shape
    p_pad = w1.shape[1]
    tm = _pick_tile(n, (512, 256, 128))
    cost = pl.CostEstimate(
        flops=2 * n * e_pad * p_pad + 2 * n * p_pad * p_pad,
        transcendentals=0,
        bytes_accessed=(n * e_pad + e_pad * p_pad + p_pad * p_pad
                        + 2 * p_pad + n * p_pad) * 4,
    )
    return pl.pallas_call(
        _proj_kernel,
        out_shape=jax.ShapeDtypeStruct((n, p_pad), out_dtype),
        grid_spec=pltpu.PrefetchScalarGridSpec(
            num_scalar_prefetch=0,
            grid=(n // tm,),
            in_specs=[
                pl.BlockSpec((tm, e_pad), lambda i: (i, 0)),
                pl.BlockSpec((e_pad, p_pad), lambda i: (0, 0)),
                pl.BlockSpec((1, p_pad), lambda i: (0, 0)),
                pl.BlockSpec((p_pad, p_pad), lambda i: (0, 0)),
                pl.BlockSpec((1, p_pad), lambda i: (0, 0)),
            ],
            out_specs=pl.BlockSpec((tm, p_pad), lambda i: (i, 0)),
        ),
        compiler_params=pltpu.CompilerParams(
            dimension_semantics=("parallel",)),
        cost_estimate=cost,
    )(x, w1, b1, w2, b2)


# ---------------------------------------------------------------------------
# Parameter construction (mimics nn.Linear default init, deterministic)
# ---------------------------------------------------------------------------
def _init_linear(key, in_dim, out_dim):
    k1, k2 = jax.random.split(key)
    bound = 1.0 / jnp.sqrt(jnp.float32(in_dim))
    w = jax.random.uniform(k1, (in_dim, out_dim), jnp.float32, -bound, bound)
    b = jax.random.uniform(k2, (out_dim,), jnp.float32, -bound, bound)
    return w, b


def init_gcl_params(key, nlayers, in_dim, hidden_dim, emb_dim, proj_dim):
    keys = jax.random.split(key, nlayers + 2)
    gnn = []
    dims = [in_dim] + [hidden_dim] * (nlayers - 1) + [emb_dim]
    for i in range(nlayers):
        gnn.append(_init_linear(keys[i], dims[i], dims[i + 1]))
    proj = [
        _init_linear(keys[nlayers], emb_dim, proj_dim),
        _init_linear(keys[nlayers + 1], proj_dim, proj_dim),
    ]
    return {"gnn": gnn, "proj": proj}


# ---------------------------------------------------------------------------
# GCL forward (eval mode: dropout / dropout_adj are identity)
# ---------------------------------------------------------------------------
def gcl_forward(params, x, adj):
    n, in_dim = x.shape
    n_pad = _round_up(max(n, _LANE), _LANE)
    in_pad = _round_up(in_dim, _LANE)

    # TODO(synk): if the same adjacency is reused across many forward calls
    # (contrastive branches), hoist quantize_adj out of the jitted forward.
    adj_q, adj_scale = quantize_adj(adj, n_pad)

    x_p = _pad2(x, n_pad, in_pad).astype(jnp.bfloat16)

    h = x_p
    nl = len(params["gnn"])
    for li, (w, b) in enumerate(params["gnn"]):
        is_last = li == nl - 1
        f_in = h.shape[1]
        f_out_pad = _round_up(w.shape[1], _LANE)
        w_p = _pad2(w, f_in, f_out_pad).astype(jnp.bfloat16)
        b_p = jnp.pad(b, (0, f_out_pad - b.shape[0])).reshape(1, -1)
        # H = X @ W + b, computed once; bf16 output feeds the MXU A@H matmul.
        # (Padded rows get H = b, harmless because A's padded columns are 0.)
        h_lin = linear(h, w_p, b_p, apply_relu=False, out_dtype=jnp.bfloat16)
        # Message passing (u_mul_e + sum over incoming edges): Y = A @ H.
        h = spmm(adj_q, adj_scale, h_lin, apply_relu=not is_last,
                 out_dtype=jnp.float32 if is_last else jnp.bfloat16)

    embedding_p = h                                    # (n_pad, emb_pad) f32

    (w1, b1), (w2, b2) = params["proj"]
    emb_dim, proj_dim = w1.shape[0], w2.shape[1]
    e_pad = embedding_p.shape[1]
    p_pad = _round_up(proj_dim, _LANE)
    w1_p = _pad2(w1, e_pad, p_pad)
    b1_p = jnp.pad(b1, (0, p_pad - b1.shape[0])).reshape(1, -1)
    w2_p = _pad2(w2, p_pad, p_pad)
    b2_p = jnp.pad(b2, (0, p_pad - b2.shape[0])).reshape(1, -1)
    z_p = proj_head(embedding_p, w1_p, b1_p, w2_p, b2_p)

    return z_p[:n, :proj_dim], embedding_p[:n, :emb_dim]


# Pure-JAX reference (same math, f32) for a loose numerical check.
def gcl_reference(params, x, adj):
    h = x
    for (w, b) in params["gnn"][:-1]:
        h = jnp.maximum(adj @ (h @ w + b), 0.0)
    w, b = params["gnn"][-1]
    embedding = adj @ (h @ w + b)
    (w1, b1), (w2, b2) = params["proj"]
    z = jnp.maximum(embedding @ w1 + b1, 0.0) @ w2 + b2
    return z, embedding


# ---------------------------------------------------------------------------
if __name__ == "__main__":
    # small shapes consistent with the module
    N = 64          # number of graph nodes
    IN_DIM = 32
    HIDDEN = 32
    EMB = 16
    PROJ = 16
    NLAYERS = 2

    key = jax.random.PRNGKey(0)
    k_x, k_a, k_p, k_t = jax.random.split(key, 4)

    x = jax.random.normal(k_x, (N, IN_DIM), jnp.float32)
    # dense weighted adjacency (row = destination node, col = source node)
    adj_raw = jax.random.uniform(k_a, (N, N), jnp.float32)
    adj = adj_raw / jnp.sum(adj_raw, axis=1, keepdims=True)  # row-normalized

    params = init_gcl_params(k_p, NLAYERS, IN_DIM, HIDDEN, EMB, PROJ)

    z, embedding = jax.jit(gcl_forward)(params, x, adj)
    jax.block_until_ready((z, embedding))

    assert z.shape == (N, PROJ) and embedding.shape == (N, EMB)
    assert jnp.all(jnp.isfinite(z)) and jnp.all(jnp.isfinite(embedding))

    # Loose correctness check vs f32 reference (int8 A + bf16 H streaming).
    z_ref, e_ref = gcl_reference(params, x, adj)
    scale = 1.0 + float(jnp.maximum(jnp.max(jnp.abs(z_ref)),
                                    jnp.max(jnp.abs(e_ref))))
    assert float(jnp.max(jnp.abs(z - z_ref))) < 3e-2 * scale
    assert float(jnp.max(jnp.abs(embedding - e_ref))) < 3e-2 * scale

    # Also exercise the large-graph (k-tiled, accumulator) spmm path.
    n2, f2 = 384, 128
    a2 = jax.random.uniform(k_t, (n2, n2), jnp.float32)
    a2 = a2 / jnp.sum(a2, axis=1, keepdims=True)
    h2 = jax.random.normal(jax.random.fold_in(k_t, 1), (n2, f2), jnp.float32)
    a2_q, a2_s = quantize_adj(a2, n2)
    y2 = jax.jit(functools.partial(spmm, apply_relu=False, force_ktiled=True))(
        a2_q, a2_s, h2.astype(jnp.bfloat16))
    jax.block_until_ready(y2)
    y2_ref = (a2_q.astype(jnp.float32) * a2_s) @ h2
    assert float(jnp.max(jnp.abs(y2 - y2_ref))) < 2e-2 * (
        1.0 + float(jnp.max(jnp.abs(y2_ref))))

    print("KERNEL_OK")
</pallas_src>

<mosaic_0001>
module attributes {stable_mosaic.version = 11 : i64} {
  func.func @_linear_kernel(%arg0: i32, %arg1: memref<128x128xbf16, #tpu.memory_space<vmem>>, %arg2: memref<128x128xbf16, #tpu.memory_space<vmem>>, %arg3: memref<1x128xf32, #tpu.memory_space<vmem>>, %arg4: memref<128x128xbf16, #tpu.memory_space<vmem>>) attributes {dimension_semantics = [#tpu.dimension_semantics<parallel>], iteration_bounds = array<i64: 1>, scalar_prefetch = 0 : i64, scratch_operands = 0 : i64, tpu.core_type = #tpu.core_type<tc>, window_params = [{transform_indices = @transform_0, window_bounds = array<i64: 128, 128>}, {pipeline_mode = #tpu.pipeline_mode<synchronous>, transform_indices = @transform_1, window_bounds = array<i64: 128, 128>}, {pipeline_mode = #tpu.pipeline_mode<synchronous>, transform_indices = @transform_2, window_bounds = array<i64: 1, 128>}, {transform_indices = @transform_3, window_bounds = array<i64: 128, 128>}]} {
    %c0 = arith.constant 0 : index
    %c0_0 = arith.constant 0 : index
    %0 = vector.load %arg1[%c0, %c0_0] : memref<128x128xbf16, #tpu.memory_space<vmem>>, vector<128x128xbf16>
    %c0_1 = arith.constant 0 : index
    %c0_2 = arith.constant 0 : index
    %1 = vector.load %arg2[%c0_1, %c0_2] : memref<128x128xbf16, #tpu.memory_space<vmem>>, vector<128x128xbf16>
    %cst = arith.constant dense<0.000000e+00> : vector<128x128xf32>
    %2 = tpu.matmul %0, %1, %cst {dimension_numbers = #tpu.dot_dimension_numbers<[1], [0], [0], [1], [0, 0, 1, 1], [], []>} : vector<128x128xbf16>, vector<128x128xbf16>, vector<128x128xf32> -> vector<128x128xf32>
    %c0_3 = arith.constant 0 : index
    %c0_4 = arith.constant 0 : index
    %3 = vector.load %arg3[%c0_3, %c0_4] : memref<1x128xf32, #tpu.memory_space<vmem>>, vector<1x128xf32>
    %4 = vector.broadcast %3 : vector<1x128xf32> to vector<128x128xf32>
    %5 = arith.addf %2, %4 : vector<128x128xf32>
    %6 = arith.truncf %5 : vector<128x128xf32> to vector<128x128xbf16>
    %c0_5 = arith.constant 0 : index
    %c0_6 = arith.constant 0 : index
    %7 = vector.load %arg4[%c0_5, %c0_6] : memref<128x128xbf16, #tpu.memory_space<vmem>>, vector<128x128xbf16>
    tpu.vector_store %arg4[%c0_5, %c0_6], %6 {strides = array<i32>} : memref<128x128xbf16, #tpu.memory_space<vmem>>, vector<128x128xbf16>,
    return
  }
  func.func @transform_0(%arg0: i32) -> (i32, i32) {
    %c0_i32 = arith.constant 0 : i32
    %c0_i32_0 = arith.constant 0 : i32
    return %arg0, %c0_i32 : i32, i32
  }
  func.func @transform_1(%arg0: i32) -> (i32, i32) {
    %c0_i32 = arith.constant 0 : i32
    %c0_i32_0 = arith.constant 0 : i32
    %c0_i32_1 = arith.constant 0 : i32
    return %c0_i32, %c0_i32_0 : i32, i32
  }
  func.func @transform_2(%arg0: i32) -> (i32, i32) {
    %c0_i32 = arith.constant 0 : i32
    %c0_i32_0 = arith.constant 0 : i32
    %c0_i32_1 = arith.constant 0 : i32
    return %c0_i32, %c0_i32_0 : i32, i32
  }
  func.func @transform_3(%arg0: i32) -> (i32, i32) {
    %c0_i32 = arith.constant 0 : i32
    %c0_i32_0 = arith.constant 0 : i32
    return %arg0, %c0_i32 : i32, i32
  }
}

module attributes {stable_mosaic.version = 11 : i64} {
  func.func @_spmm_stripe_kernel(%arg0: i32, %arg1: memref<128x128xi8, #tpu.memory_space<vmem>>, %arg2: memref<128x1xf32, #tpu.memory_space<vmem>>, %arg3: memref<128x128xbf16, #tpu.memory_space<vmem>>, %arg4: memref<128x128xbf16, #tpu.memory_space<vmem>>) attributes {dimension_semantics = [#tpu.dimension_semantics<parallel>], iteration_bounds = array<i64: 1>, scalar_prefetch = 0 : i64, scratch_operands = 0 : i64, tpu.core_type = #tpu.core_type<tc>, window_params = [{transform_indices = @transform_0, window_bounds = array<i64: 128, 128>}, {transform_indices = @transform_1, window_bounds = array<i64: 128, 1>}, {pipeline_mode = #tpu.pipeline_mode<synchronous>, transform_indices = @transform_2, window_bounds = array<i64: 128, 128>}, {transform_indices = @transform_3, window_bounds = array<i64: 128, 128>}]} {
    %c0 = arith.constant 0 : index
    %c0_0 = arith.constant 0 : index
    %0 = vector.load %arg1[%c0, %c0_0] : memref<128x128xi8, #tpu.memory_space<vmem>>, vector<128x128xi8>
    %1 = arith.sitofp %0 : vector<128x128xi8> to vector<128x128xbf16>
    %c0_1 = arith.constant 0 : index
    %c0_2 = arith.constant 0 : index
    %2 = vector.load %arg3[%c0_1, %c0_2] : memref<128x128xbf16, #tpu.memory_space<vmem>>, vector<128x128xbf16>
    %cst = arith.constant dense<0.000000e+00> : vector<128x128xf32>
    %3 = tpu.matmul %1, %2, %cst {dimension_numbers = #tpu.dot_dimension_numbers<[1], [0], [0], [1], [0, 0, 1, 1], [], []>} : vector<128x128xbf16>, vector<128x128xbf16>, vector<128x128xf32> -> vector<128x128xf32>
    %c0_3 = arith.constant 0 : index
    %c0_4 = arith.constant 0 : index
    %4 = vector.load %arg2[%c0_3, %c0_4] : memref<128x1xf32, #tpu.memory_space<vmem>>, vector<128x1xf32>
    %5 = vector.broadcast %4 : vector<128x1xf32> to vector<128x128xf32>
    %6 = arith.mulf %3, %5 : vector<128x128xf32>
    %cst_5 = arith.constant 0.000000e+00 : f32
    %7 = vector.broadcast %cst_5 : f32 to vector<128x128xf32>
    %8 = arith.maximumf %6, %7 : vector<128x128xf32>
    %9 = arith.truncf %8 : vector<128x128xf32> to vector<128x128xbf16>
    %c0_6 = arith.constant 0 : index
    %c0_7 = arith.constant 0 : index
    %10 = vector.load %arg4[%c0_6, %c0_7] : memref<128x128xbf16, #tpu.memory_space<vmem>>, vector<128x128xbf16>
    tpu.vector_store %arg4[%c0_6, %c0_7], %9 {strides = array<i32>} : memref<128x128xbf16, #tpu.memory_space<vmem>>, vector<128x128xbf16>,
    return
  }
  func.func @transform_0(%arg0: i32) -> (i32, i32) {
    %c0_i32 = arith.constant 0 : i32
    %c0_i32_0 = arith.constant 0 : i32
    return %arg0, %c0_i32 : i32, i32
  }
  func.func @transform_1(%arg0: i32) -> (i32, i32) {
    %c0_i32 = arith.constant 0 : i32
    %c0_i32_0 = arith.constant 0 : i32
    return %arg0, %c0_i32 : i32, i32
  }
  func.func @transform_2(%arg0: i32) -> (i32, i32) {
    %c0_i32 = arith.constant 0 : i32
    %c0_i32_0 = arith.constant 0 : i32
    %c0_i32_1 = arith.constant 0 : i32
    return %c0_i32, %c0_i32_0 : i32, i32
  }
  func.func @transform_3(%arg0: i32) -> (i32, i32) {
    %c0_i32 = arith.constant 0 : i32
    %c0_i32_0 = arith.constant 0 : i32
    return %arg0, %c0_i32 : i32, i32
  }
}

module attributes {stable_mosaic.version = 11 : i64} {
  func.func @_spmm_stripe_kernel(%arg0: i32, %arg1: memref<128x128xi8, #tpu.memory_space<vmem>>, %arg2: memref<128x1xf32, #tpu.memory_space<vmem>>, %arg3: memref<128x128xbf16, #tpu.memory_space<vmem>>, %arg4: memref<128x128xf32, #tpu.memory_space<vmem>>) attributes {dimension_semantics = [#tpu.dimension_semantics<parallel>], iteration_bounds = array<i64: 1>, scalar_prefetch = 0 : i64, scratch_operands = 0 : i64, tpu.core_type = #tpu.core_type<tc>, window_params = [{transform_indices = @transform_0, window_bounds = array<i64: 128, 128>}, {transform_indices = @transform_1, window_bounds = array<i64: 128, 1>}, {pipeline_mode = #tpu.pipeline_mode<synchronous>, transform_indices = @transform_2, window_bounds = array<i64: 128, 128>}, {transform_indices = @transform_3, window_bounds = array<i64: 128, 128>}]} {
    %c0 = arith.constant 0 : index
    %c0_0 = arith.constant 0 : index
    %0 = vector.load %arg1[%c0, %c0_0] : memref<128x128xi8, #tpu.memory_space<vmem>>, vector<128x128xi8>
    %1 = arith.sitofp %0 : vector<128x128xi8> to vector<128x128xbf16>
    %c0_1 = arith.constant 0 : index
    %c0_2 = arith.constant 0 : index
    %2 = vector.load %arg3[%c0_1, %c0_2] : memref<128x128xbf16, #tpu.memory_space<vmem>>, vector<128x128xbf16>
    %cst = arith.constant dense<0.000000e+00> : vector<128x128xf32>
    %3 = tpu.matmul %1, %2, %cst {dimension_numbers = #tpu.dot_dimension_numbers<[1], [0], [0], [1], [0, 0, 1, 1], [], []>} : vector<128x128xbf16>, vector<128x128xbf16>, vector<128x128xf32> -> vector<128x128xf32>
    %c0_3 = arith.constant 0 : index
    %c0_4 = arith.constant 0 : index
    %4 = vector.load %arg2[%c0_3, %c0_4] : memref<128x1xf32, #tpu.memory_space<vmem>>, vector<128x1xf32>
    %5 = vector.broadcast %4 : vector<128x1xf32> to vector<128x128xf32>
    %6 = arith.mulf %3, %5 : vector<128x128xf32>
    %c0_5 = arith.constant 0 : index
    %c0_6 = arith.constant 0 : index
    %7 = vector.load %arg4[%c0_5, %c0_6] : memref<128x128xf32, #tpu.memory_space<vmem>>, vector<128x128xf32>
    tpu.vector_store %arg4[%c0_5, %c0_6], %6 {strides = array<i32>} : memref<128x128xf32, #tpu.memory_space<vmem>>, vector<128x128xf32>,
    return
  }
  func.func @transform_0(%arg0: i32) -> (i32, i32) {
    %c0_i32 = arith.constant 0 : i32
    %c0_i32_0 = arith.constant 0 : i32
    return %arg0, %c0_i32 : i32, i32
  }
  func.func @transform_1(%arg0: i32) -> (i32, i32) {
    %c0_i32 = arith.constant 0 : i32
    %c0_i32_0 = arith.constant 0 : i32
    return %arg0, %c0_i32 : i32, i32
  }
  func.func @transform_2(%arg0: i32) -> (i32, i32) {
    %c0_i32 = arith.constant 0 : i32
    %c0_i32_0 = arith.constant 0 : i32
    %c0_i32_1 = arith.constant 0 : i32
    return %c0_i32, %c0_i32_0 : i32, i32
  }
  func.func @transform_3(%arg0: i32) -> (i32, i32) {
    %c0_i32 = arith.constant 0 : i32
    %c0_i32_0 = arith.constant 0 : i32
    return %arg0, %c0_i32 : i32, i32
  }
}

module attributes {stable_mosaic.version = 11 : i64} {
  func.func @_proj_kernel(%arg0: i32, %arg1: memref<128x128xf32, #tpu.memory_space<vmem>>, %arg2: memref<128x128xf32, #tpu.memory_space<vmem>>, %arg3: memref<1x128xf32, #tpu.memory_space<vmem>>, %arg4: memref<128x128xf32, #tpu.memory_space<vmem>>, %arg5: memref<1x128xf32, #tpu.memory_space<vmem>>, %arg6: memref<128x128xf32, #tpu.memory_space<vmem>>) attributes {dimension_semantics = [#tpu.dimension_semantics<parallel>], iteration_bounds = array<i64: 1>, scalar_prefetch = 0 : i64, scratch_operands = 0 : i64, tpu.core_type = #tpu.core_type<tc>, window_params = [{transform_indices = @transform_0, window_bounds = array<i64: 128, 128>}, {pipeline_mode = #tpu.pipeline_mode<synchronous>, transform_indices = @transform_1, window_bounds = array<i64: 128, 128>}, {pipeline_mode = #tpu.pipeline_mode<synchronous>, transform_indices = @transform_2, window_bounds = array<i64: 1, 128>}, {pipeline_mode = #tpu.pipeline_mode<synchronous>, transform_indices = @transform_3, window_bounds = array<i64: 128, 128>}, {pipeline_mode = #tpu.pipeline_mode<synchronous>, transform_indices = @transform_4, window_bounds = array<i64: 1, 128>}, {transform_indices = @transform_5, window_bounds = array<i64: 128, 128>}]} {
    %c0 = arith.constant 0 : index
    %c0_0 = arith.constant 0 : index
    %0 = vector.load %arg1[%c0, %c0_0] : memref<128x128xf32, #tpu.memory_space<vmem>>, vector<128x128xf32>
    %c0_1 = arith.constant 0 : index
    %c0_2 = arith.constant 0 : index
    %1 = vector.load %arg2[%c0_1, %c0_2] : memref<128x128xf32, #tpu.memory_space<vmem>>, vector<128x128xf32>
    %cst = arith.constant dense<0.000000e+00> : vector<128x128xf32>
    %2 = tpu.matmul %0, %1, %cst {dimension_numbers = #tpu.dot_dimension_numbers<[1], [0], [0], [1], [0, 0, 1, 1], [], []>} : vector<128x128xf32>, vector<128x128xf32>, vector<128x128xf32> -> vector<128x128xf32>
    %c0_3 = arith.constant 0 : index
    %c0_4 = arith.constant 0 : index
    %3 = vector.load %arg3[%c0_3, %c0_4] : memref<1x128xf32, #tpu.memory_space<vmem>>, vector<1x128xf32>
    %4 = vector.broadcast %3 : vector<1x128xf32> to vector<128x128xf32>
    %5 = arith.addf %2, %4 : vector<128x128xf32>
    %cst_5 = arith.constant 0.000000e+00 : f32
    %6 = vector.broadcast %cst_5 : f32 to vector<128x128xf32>
    %7 = arith.maximumf %5, %6 : vector<128x128xf32>
    %c0_6 = arith.constant 0 : index
    %c0_7 = arith.constant 0 : index
    %8 = vector.load %arg4[%c0_6, %c0_7] : memref<128x128xf32, #tpu.memory_space<vmem>>, vector<128x128xf32>
    %cst_8 = arith.constant dense<0.000000e+00> : vector<128x128xf32>
    %9 = tpu.matmul %7, %8, %cst_8 {dimension_numbers = #tpu.dot_dimension_numbers<[1], [0], [0], [1], [0, 0, 1, 1], [], []>} : vector<128x128xf32>, vector<128x128xf32>, vector<128x128xf32> -> vector<128x128xf32>
    %c0_9 = arith.constant 0 : index
    %c0_10 = arith.constant 0 : index
    %10 = vector.load %arg5[%c0_9, %c0_10] : memref<1x128xf32, #tpu.memory_space<vmem>>, vector<1x128xf32>
    %11 = vector.broadcast %10 : vector<1x128xf32> to vector<128x128xf32>
    %12 = arith.addf %9, %11 : vector<128x128xf32>
    %c0_11 = arith.constant 0 : index
    %c0_12 = arith.constant 0 : index
    %13 = vector.load %arg6[%c0_11, %c0_12] : memref<128x128xf32, #tpu.memory_space<vmem>>, vector<128x128xf32>
    tpu.vector_store %arg6[%c0_11, %c0_12], %12 {strides = array<i32>} : memref<128x128xf32, #tpu.memory_space<vmem>>, vector<128x128xf32>,
    return
  }
  func.func @transform_0(%arg0: i32) -> (i32, i32) {
    %c0_i32 = arith.constant 0 : i32
    %c0_i32_0 = arith.constant 0 : i32
    return %arg0, %c0_i32 : i32, i32
  }
  func.func @transform_1(%arg0: i32) -> (i32, i32) {
    %c0_i32 = arith.constant 0 : i32
    %c0_i32_0 = arith.constant 0 : i32
    %c0_i32_1 = arith.constant 0 : i32
    return %c0_i32, %c0_i32_0 : i32, i32
  }
  func.func @transform_2(%arg0: i32) -> (i32, i32) {
    %c0_i32 = arith.constant 0 : i32
    %c0_i32_0 = arith.constant 0 : i32
    %c0_i32_1 = arith.constant 0 : i32
    return %c0_i32, %c0_i32_0 : i32, i32
  }
  func.func @transform_3(%arg0: i32) -> (i32, i32) {
    %c0_i32 = arith.constant 0 : i32
    %c0_i32_0 = arith.constant 0 : i32
    %c0_i32_1 = arith.constant 0 : i32
    return %c0_i32, %c0_i32_0 : i32, i32
  }
  func.func @transform_4(%arg0: i32) -> (i32, i32) {
    %c0_i32 = arith.constant 0 : i32
    %c0_i32_0 = arith.constant 0 : i32
    %c0_i32_1 = arith.constant 0 : i32
    return %c0_i32, %c0_i32_0 : i32, i32
  }
  func.func @transform_5(%arg0: i32) -> (i32, i32) {
    %c0_i32 = arith.constant 0 : i32
    %c0_i32_0 = arith.constant 0 : i32
    return %arg0, %c0_i32 : i32, i32
  }
}

</mosaic_0001>

<bundles_post_ra>
// kernel: gcl_forward.5
= control target key start
LH: loop header
LB: loop body
LE: loop exit
PB: predicated region body
PF: predicated region fallthrough
CT: control target
= control target key end

     0   :  { %s602_s1 = inlined_call_operand.vmem [shape: bf16[128,128], index: 1, kind: input, shape index: {}]   ;;  %s603_s0 = inlined_call_operand.vmem [shape: bf16[128,128], index: 0, kind: input, shape index: {}]   ;;  %s604_s2 = inlined_call_operand.vmem [shape: f32[1,128], index: 2, kind: input, shape index: {}]   ;;  %s605_s3 = inlined_call_operand.vmem [shape: bf16[128,128], index: 3, kind: output, shape index: {}]  }
   0x1   :  { %v491_v0 = vld [vmem:[%s602_s1] sm:$0xff]   ;;  %v492_v1 = vld [vmem:[%s602_s1 + $0x8] sm:$0xff]   ;;  %v493_v2 = vld [vmem:[%s602_s1 + $0x10] sm:$0xff]  }
   0x2   :  { %443 = vmatprep.subr.bf16.mxu0 %v491_v0  ;;  %475 = vmatprep.subr.bf16.mxu1 %v491_v0  ;;  %v494_v3 = vld [vmem:[%s602_s1 + $0x18] sm:$0xff]   ;;  %v499_v4 = vld [vmem:[%s603_s0] sm:$0xff]   ;;  %v496_v7 = vld [vmem:[%s602_s1 + $0x28] sm:$0xff]  }
   0x3   :  { %444 = vmatpush3.bf16.msra.mxu0 %v491_v0  ;;  %483 = vmatpush3.bf16.msra.mxu1 %v491_v0  ;;  %v500_v5 = vld [vmem:[%s603_s0 + $0x20] sm:$0xff]   ;;  %v497_v8 = vld [vmem:[%s602_s1 + $0x30] sm:$0xff]   ;;  %v498_v9 = vld [vmem:[%s602_s1 + $0x38] sm:$0xff]  }
   0x4   :  { %445 = vmatprep.subr.bf16.mxu0 %v492_v1  ;;  %476 = vmatprep.subr.bf16.mxu1 %v492_v1  ;;  %v495_v6 = vld [vmem:[%s602_s1 + $0x20] sm:$0xff]   ;;  %v501_v10 = vld [vmem:[%s603_s0 + $0x8] sm:$0xff]   ;;  %v503_v12 = vld [vmem:[%s603_s0 + $0x10] sm:$0xff]  }
   0x5   :  { %459 = vmatprep.mubr.bf16.mxu0 %v499_v4  ;;  %467 = vmatprep.mubr.bf16.mxu1 %v500_v5  ;;  %v502_v11 = vld [vmem:[%s603_s0 + $0x28] sm:$0xff]   ;;  %v504_v13 = vld [vmem:[%s603_s0 + $0x30] sm:$0xff]   ;;  %v505_v14 = vld [vmem:[%s603_s0 + $0x18] sm:$0xff]  }
   0x6   :  { %v506_v15 = vld [vmem:[%s603_s0 + $0x38] sm:$0xff]   ;;  %v331_v17 = vld [vmem:[%s604_s2] ss:$0 sm:$0xff] }
   0x7   :  { %446 = vmatpush3.bf16.msra.mxu0 %v492_v1  ;;  %484 = vmatpush3.bf16.msra.mxu1 %v492_v1 }
   0x8   :  { %447 = vmatprep.subr.bf16.mxu0 %v493_v2  ;;  %477 = vmatprep.subr.bf16.mxu1 %v493_v2 }
   0xb   :  { %448 = vmatpush3.bf16.msra.mxu0 %v493_v2  ;;  %485 = vmatpush3.bf16.msra.mxu1 %v493_v2 }
   0xc   :  { %449 = vmatprep.subr.bf16.mxu0 %v494_v3  ;;  %478 = vmatprep.subr.bf16.mxu1 %v494_v3 }
   0xf   :  { %450 = vmatpush3.bf16.msra.mxu0 %v494_v3  ;;  %486 = vmatpush3.bf16.msra.mxu1 %v494_v3 }
  0x10   :  { %451 = vmatprep.subr.bf16.mxu0 %v495_v6  ;;  %479 = vmatprep.subr.bf16.mxu1 %v495_v6 }
  0x13   :  { %452 = vmatpush3.bf16.msra.mxu0 %v495_v6  ;;  %487 = vmatpush3.bf16.msra.mxu1 %v495_v6 }
  0x14   :  { %453 = vmatprep.subr.bf16.mxu0 %v496_v7  ;;  %480 = vmatprep.subr.bf16.mxu1 %v496_v7 }
  0x17   :  { %454 = vmatpush3.bf16.msra.mxu0 %v496_v7  ;;  %488 = vmatpush3.bf16.msra.mxu1 %v496_v7 }
  0x18   :  { %455 = vmatprep.subr.bf16.mxu0 %v497_v8  ;;  %481 = vmatprep.subr.bf16.mxu1 %v497_v8 }
  0x1b   :  { %456 = vmatpush3.bf16.msra.mxu0 %v497_v8  ;;  %489 = vmatpush3.bf16.msra.mxu1 %v497_v8 }
  0x1c   :  { %457 = vmatprep.subr.bf16.mxu0 %v498_v9  ;;  %482 = vmatprep.subr.bf16.mxu1 %v498_v9 }
  0x1f   :  { %458 = vmatpush3.bf16.msra.mxu0 %v498_v9  ;;  %490 = vmatpush3.bf16.msra.mxu1 %v498_v9 }
  0x22   :  { %460 = vmatmul.mubr.bf16.vlgmr.msra.gmra.mrb[0].mxu0 %v501_v10  ;;  %468 = vmatmul.mubr.bf16.vlgmr.msra.gmra.mrb[0].mxu1 %v502_v11 }
  0x23   :  { %463 = vmatprep.mubr.bf16.mxu0 %v503_v12  ;;  %471 = vmatprep.mubr.bf16.mxu1 %v504_v13 }
  0x2a   :  { %464 = vmatmul.mubr.bf16.gmra.mrb[4].mxu0 %v505_v14  ;;  %472 = vmatmul.mubr.bf16.gmra.mrb[4].mxu1 %v506_v15 }
  0xf5   :  { %v461_v16 = vpop.f32.mrb[0].mxu0  ;;  %v469_v18 = vpop.f32.mrb[0].mxu1 }
  0xf6   :  { %v184_v19 = vpop.f32.mrb[1].mxu0  ;;  %v216_v20 = vpop.f32.mrb[1].mxu1  ;;  %v193_v23 = vadd.f32 %v461_v16, %v331_v17  ;;  %v225_v24 = vadd.f32 %v469_v18, %v331_v17 }
  0xf7   :  { %v462_v21 = vpop.f32.mrb[2].mxu0  ;;  %v470_v22 = vpop.f32.mrb[2].mxu1  ;;  %v185_v29 = vadd.f32 %v331_v17, %v184_v19  ;;  %v217_v30 = vadd.f32 %v331_v17, %v216_v20 }
  0xf8   :  { %v196_v25 = vadd.f32 %v462_v21, %v331_v17  ;;  %v228_v26 = vadd.f32 %v470_v22, %v331_v17  ;;  %v187_v27 = vpop.f32.mrb[3].mxu0  ;;  %v219_v28 = vpop.f32.mrb[3].mxu1 }
  0xf9   :  { %v188_v31 = vadd.f32 %v331_v17, %v187_v27  ;;  %v220_v32 = vadd.f32 %v331_v17, %v219_v28 }
  0xfa   :  { %v388_v33 = vpack.c.bf16 %v196_v25, %v193_v23  ;;  %v408_v34 = vpack.c.bf16 %v228_v26, %v225_v24 }
  0xfb   :  { %v383_v35 = vpack.c.bf16 %v188_v31, %v185_v29  ;;  %v403_v36 = vpack.c.bf16 %v220_v32, %v217_v30 }
  0xfc   :  { %420 = vst [vmem:[%s605_s3 + $0x8] sm:$0xff] %v388_v33   ;;  %424 = vst [vmem:[%s605_s3 + $0x28] sm:$0xff] %v408_v34  }
  0xfd   :  { %384 = vst [vmem:[%s605_s3] sm:$0xff] %v383_v35   ;;  %423 = vst [vmem:[%s605_s3 + $0x20] sm:$0xff] %v403_v36   ;;  %v465_v37 = vpop.f32.mrb[4].mxu0  ;;  %v473_v38 = vpop.f32.mrb[4].mxu1 }
  0xfe   :  { %v200_v39 = vpop.f32.mrb[5].mxu0  ;;  %v232_v40 = vpop.f32.mrb[5].mxu1  ;;  %v209_v43 = vadd.f32 %v465_v37, %v331_v17  ;;  %v241_v44 = vadd.f32 %v473_v38, %v331_v17 }
  0xff   :  { %v466_v41 = vpop.f32.mrb[6].mxu0  ;;  %v474_v42 = vpop.f32.mrb[6].mxu1  ;;  %v201_v49 = vadd.f32 %v331_v17, %v200_v39  ;;  %v233_v50 = vadd.f32 %v331_v17, %v232_v40 }
 0x100   :  { %v212_v45 = vadd.f32 %v466_v41, %v331_v17  ;;  %v244_v46 = vadd.f32 %v474_v42, %v331_v17  ;;  %v203_v47 = vpop.f32.mrb[7].mxu0  ;;  %v235_v48 = vpop.f32.mrb[7].mxu1 }
 0x101   :  { %v204_v51 = vadd.f32 %v331_v17, %v203_v47  ;;  %v236_v52 = vadd.f32 %v331_v17, %v235_v48 }
 0x102   :  { %v398_v53 = vpack.c.bf16 %v212_v45, %v209_v43  ;;  %v418_v54 = vpack.c.bf16 %v244_v46, %v241_v44 }
 0x103   :  { %v393_v55 = vpack.c.bf16 %v204_v51, %v201_v49  ;;  %v413_v56 = vpack.c.bf16 %v236_v52, %v233_v50 }
 0x104   :  { %422 = vst [vmem:[%s605_s3 + $0x18] sm:$0xff] %v398_v53   ;;  %426 = vst [vmem:[%s605_s3 + $0x38] sm:$0xff] %v418_v54  }
 0x105   :  { %421 = vst [vmem:[%s605_s3 + $0x10] sm:$0xff] %v393_v55   ;;  %425 = vst [vmem:[%s605_s3 + $0x30] sm:$0xff] %v413_v56  }

// kernel: gcl_forward.8
= control target key start
LH: loop header
LB: loop body
LE: loop exit
PB: predicated region body
PF: predicated region fallthrough
CT: control target
= control target key end

     0   :  { %v403_v1 = vmov 0   ;;  %s564_s2 = inlined_call_operand.vmem [shape: bf16[128,128], index: 2, kind: input, shape index: {}]   ;;  %s565_s0 = inlined_call_operand.vmem [shape: s8[128,128], index: 0, kind: input, shape index: {}]   ;;  %s566_s1 = inlined_call_operand.vmem [shape: f32[128,1], index: 1, kind: input, shape index: {}]   ;;  %s567_s3 = inlined_call_operand.vmem [shape: f32[128,128], index: 3, kind: output, shape index: {}]  }
   0x1   :  { %v395_v0 = vld [vmem:[%s564_s2] sm:$0xff]   ;;  %394 = vset.pattern.permute.xlu1 %v403_v1  ;;  %393 = vset.pattern.permute.xlu0 %v403_v1  ;;  %v396_v2 = vld [vmem:[%s564_s2 + $0x8] sm:$0xff]   ;;  %v397_v3 = vld [vmem:[%s564_s2 + $0x10] sm:$0xff]  }
   0x2   :  { %344 = vmatprep.subr.bf16.mxu0 %v395_v0  ;;  %376 = vmatprep.subr.bf16.mxu1 %v395_v0  ;;  %v398_v4 = vld [vmem:[%s564_s2 + $0x18] sm:$0xff]   ;;  %v439_v5 = vld [vmem:[%s565_s0] sm:$0xff]  ;;  %v444_v6 = vld [vmem:[%s565_s0 + $0x10] sm:$0xff] }
   0x3   :  { %345 = vmatpush3.bf16.msra.mxu0 %v395_v0  ;;  %384 = vmatpush3.bf16.msra.mxu1 %v395_v0  ;;  %v19_v7 = vunpack.c.l.s8.bf16 %v439_v5  ;;  %v23_v8 = vunpack.c.l.s8.bf16 %v444_v6  ;;  %v190_v9 = vld [vmem:[%s566_s1 + $0x10] sm:$0xff]  ;;  %v188_v10 = vld [vmem:[%s566_s1] sm:$0xff]  ;;  %v191_v11 = vld [vmem:[%s566_s1 + $0x18] sm:$0xff]  ;;  %v20_v27 = vunpack.c.h.s8.bf16 %v439_v5  ;;  %v24_v28 = vunpack.c.h.s8.bf16 %v444_v6 }
   0x4   :  { %346 = vmatprep.subr.bf16.mxu0 %v396_v2  ;;  %377 = vmatprep.subr.bf16.mxu1 %v396_v2  ;;  %v189_v12 = vld [vmem:[%s566_s1 + $0x8] sm:$0xff]  ;;  %v399_v13 = vld [vmem:[%s564_s2 + $0x20] sm:$0xff]   ;;  %v195_v17 = vld [vmem:[%s566_s1 + $0x38] sm:$0xff] }
   0x5   :  { %216 = vperm.xlu1 %394, %v190_v9   ;;  %206 = vperm.xlu0 %393, %v188_v10   ;;  %v193_v14 = vld [vmem:[%s566_s1 + $0x28] sm:$0xff]  ;;  %v192_v15 = vld [vmem:[%s566_s1 + $0x20] sm:$0xff]  ;;  %v194_v18 = vld [vmem:[%s566_s1 + $0x30] sm:$0xff] }
   0x6   :  { %360 = vmatprep.mubr.bf16.mxu0 %v19_v7  ;;  %368 = vmatprep.mubr.bf16.mxu1 %v23_v8  ;;  %v400_v16 = vld [vmem:[%s564_s2 + $0x28] sm:$0xff]   ;;  %v401_v19 = vld [vmem:[%s564_s2 + $0x30] sm:$0xff]   ;;  %v196_v21 = vld [vmem:[%s566_s1 + $0x40] sm:$0xff] }
   0x7   :  { %347 = vmatpush3.bf16.msra.mxu0 %v396_v2  ;;  %385 = vmatpush3.bf16.msra.mxu1 %v396_v2  ;;  %v197_v20 = vld [vmem:[%s566_s1 + $0x48] sm:$0xff]  ;;  %v402_v22 = vld [vmem:[%s564_s2 + $0x38] sm:$0xff]   ;;  %v198_v24 = vld [vmem:[%s566_s1 + $0x50] sm:$0xff] }
   0x8   :  { %348 = vmatprep.subr.bf16.mxu0 %v397_v3  ;;  %378 = vmatprep.subr.bf16.mxu1 %v397_v3  ;;  %v199_v23 = vld [vmem:[%s566_s1 + $0x58] sm:$0xff]  ;;  %v16_v25 = vld [vmem:[%s565_s0 + $0x8] sm:$0xff]  ;;  %v200_v32 = vld [vmem:[%s566_s1 + $0x60] sm:$0xff] }
   0x9   :  { %221 = vperm.xlu1 %394, %v191_v11   ;;  %211 = vperm.xlu0 %393, %v189_v12   ;;  %v18_v26 = vld [vmem:[%s565_s0 + $0x18] sm:$0xff]  ;;  %v21_v29 = vunpack.c.l.s8.bf16 %v16_v25  ;;  %v201_v31 = vld [vmem:[%s566_s1 + $0x68] sm:$0xff]  ;;  %v202_v34 = vld [vmem:[%s566_s1 + $0x70] sm:$0xff]  ;;  %v22_v35 = vunpack.c.h.s8.bf16 %v16_v25 }
   0xa   :  { %v25_v30 = vunpack.c.l.s8.bf16 %v18_v26  ;;  %v203_v33 = vld [vmem:[%s566_s1 + $0x78] sm:$0xff]  ;;  %v26_v36 = vunpack.c.h.s8.bf16 %v18_v26 }
   0xb   :  { %349 = vmatpush3.bf16.msra.mxu0 %v397_v3  ;;  %386 = vmatpush3.bf16.msra.mxu1 %v397_v3 }
   0xc   :  { %350 = vmatprep.subr.bf16.mxu0 %v398_v4  ;;  %379 = vmatprep.subr.bf16.mxu1 %v398_v4 }
   0xd   :  { %231 = vperm.xlu1 %394, %v193_v14   ;;  %226 = vperm.xlu0 %393, %v192_v15  }
   0xf   :  { %351 = vmatpush3.bf16.msra.mxu0 %v398_v4  ;;  %387 = vmatpush3.bf16.msra.mxu1 %v398_v4 }
  0x10   :  { %352 = vmatprep.subr.bf16.mxu0 %v399_v13  ;;  %380 = vmatprep.subr.bf16.mxu1 %v399_v13 }
  0x11   :  { %241 = vperm.xlu1 %394, %v195_v17   ;;  %236 = vperm.xlu0 %393, %v194_v18  }
  0x13   :  { %353 = vmatpush3.bf16.msra.mxu0 %v399_v13  ;;  %388 = vmatpush3.bf16.msra.mxu1 %v399_v13 }
  0x14   :  { %354 = vmatprep.subr.bf16.mxu0 %v400_v16  ;;  %381 = vmatprep.subr.bf16.mxu1 %v400_v16 }
  0x15   :  { %251 = vperm.xlu1 %394, %v197_v20   ;;  %246 = vperm.xlu0 %393, %v196_v21  }
  0x17   :  { %355 = vmatpush3.bf16.msra.mxu0 %v400_v16  ;;  %389 = vmatpush3.bf16.msra.mxu1 %v400_v16 }
  0x18   :  { %356 = vmatprep.subr.bf16.mxu0 %v401_v19  ;;  %382 = vmatprep.subr.bf16.mxu1 %v401_v19 }
  0x19   :  { %261 = vperm.xlu1 %394, %v199_v23   ;;  %256 = vperm.xlu0 %393, %v198_v24  }
  0x1b   :  { %357 = vmatpush3.bf16.msra.mxu0 %v401_v19  ;;  %390 = vmatpush3.bf16.msra.mxu1 %v401_v19 }
  0x1c   :  { %358 = vmatprep.subr.bf16.mxu0 %v402_v22  ;;  %383 = vmatprep.subr.bf16.mxu1 %v402_v22 }
  0x1d   :  { %271 = vperm.xlu1 %394, %v201_v31   ;;  %266 = vperm.xlu0 %393, %v200_v32  }
  0x1f   :  { %359 = vmatpush3.bf16.msra.mxu0 %v402_v22  ;;  %391 = vmatpush3.bf16.msra.mxu1 %v402_v22 }
  0x21   :  { %281 = vperm.xlu1 %394, %v203_v33   ;;  %276 = vperm.xlu0 %393, %v202_v34  }
  0x22   :  { %361 = vmatmul.mubr.bf16.vlgmr.msra.gmra.mrb[0].mxu0 %v20_v27  ;;  %369 = vmatmul.mubr.bf16.vlgmr.msra.gmra.mrb[0].mxu1 %v24_v28 }
  0x23   :  { %364 = vmatprep.mubr.bf16.mxu0 %v21_v29  ;;  %372 = vmatprep.mubr.bf16.mxu1 %v25_v30 }
  0x2a   :  { %365 = vmatmul.mubr.bf16.gmra.mrb[4].mxu0 %v22_v35  ;;  %373 = vmatmul.mubr.bf16.gmra.mrb[4].mxu1 %v26_v36 }
  0x84   :  { %v217_v37 = vpop.permute.xlu1 %216  ;;  %v207_v38 = vpop.permute.xlu0 %206 }
  0x88   :  { %v222_v39 = vpop.permute.xlu1 %221  ;;  %v212_v40 = vpop.permute.xlu0 %211 }
  0x8c   :  { %v232_v41 = vpop.permute.xlu1 %231  ;;  %v227_v42 = vpop.permute.xlu0 %226 }
  0x90   :  { %v242_v43 = vpop.permute.xlu1 %241  ;;  %v237_v44 = vpop.permute.xlu0 %236 }
  0x94   :  { %v252_v45 = vpop.permute.xlu1 %251  ;;  %v247_v46 = vpop.permute.xlu0 %246 }
  0x98   :  { %v262_v47 = vpop.permute.xlu1 %261  ;;  %v257_v48 = vpop.permute.xlu0 %256 }
  0x9c   :  { %v272_v49 = vpop.permute.xlu1 %271  ;;  %v267_v50 = vpop.permute.xlu0 %266 }
  0xa0   :  { %v282_v3 = vpop.permute.xlu1 %281  ;;  %v277_v4 = vpop.permute.xlu0 %276 }
  0xf5   :  { %v362_v51 = vpop.f32.mrb[0].mxu0  ;;  %v370_v52 = vpop.f32.mrb[0].mxu1 }
  0xf6   :  { %v286_v53 = vmul.f32 %v362_v51, %v217_v37  ;;  %v294_v54 = vmul.f32 %v370_v52, %v257_v48  ;;  %v125_v55 = vpop.f32.mrb[1].mxu0  ;;  %v157_v56 = vpop.f32.mrb[1].mxu1 }
  0xf7   :  { %v284_v57 = vmul.f32 %v207_v38, %v125_v55  ;;  %v292_v58 = vmul.f32 %v247_v46, %v157_v56  ;;  %v363_v59 = vpop.f32.mrb[2].mxu0  ;;  %v371_v60 = vpop.f32.mrb[2].mxu1 }
  0xf8   :  { %302 = vst [vmem:[%s567_s3 + $0x10] sm:$0xff] %v286_v53  ;;  %310 = vst [vmem:[%s567_s3 + $0x50] sm:$0xff] %v294_v54  ;;  %v287_v61 = vmul.f32 %v363_v59, %v222_v39  ;;  %v295_v62 = vmul.f32 %v371_v60, %v262_v47  ;;  %v128_v63 = vpop.f32.mrb[3].mxu0  ;;  %v160_v0 = vpop.f32.mrb[3].mxu1 }
  0xf9   :  { %300 = vst [vmem:[%s567_s3] sm:$0xff] %v284_v57  ;;  %308 = vst [vmem:[%s567_s3 + $0x40] sm:$0xff] %v292_v58  ;;  %v285_v1 = vmul.f32 %v212_v40, %v128_v63  ;;  %v293_v2 = vmul.f32 %v252_v45, %v160_v0 }
  0xfa   :  { %303 = vst [vmem:[%s567_s3 + $0x18] sm:$0xff] %v287_v61  ;;  %311 = vst [vmem:[%s567_s3 + $0x58] sm:$0xff] %v295_v62 }
  0xfb   :  { %301 = vst [vmem:[%s567_s3 + $0x8] sm:$0xff] %v285_v1  ;;  %309 = vst [vmem:[%s567_s3 + $0x48] sm:$0xff] %v293_v2 }
  0xfd   :  { %v366_v5 = vpop.f32.mrb[4].mxu0  ;;  %v374_v6 = vpop.f32.mrb[4].mxu1 }
  0xfe   :  { %v290_v7 = vmul.f32 %v366_v5, %v237_v44  ;;  %v298_v8 = vmul.f32 %v374_v6, %v277_v4  ;;  %v141_v9 = vpop.f32.mrb[5].mxu0  ;;  %v173_v10 = vpop.f32.mrb[5].mxu1 }
  0xff   :  { %v288_v11 = vmul.f32 %v227_v42, %v141_v9  ;;  %v296_v12 = vmul.f32 %v267_v50, %v173_v10  ;;  %v367_v13 = vpop.f32.mrb[6].mxu0  ;;  %v375_v14 = vpop.f32.mrb[6].mxu1 }
 0x100   :  { %306 = vst [vmem:[%s567_s3 + $0x30] sm:$0xff] %v290_v7  ;;  %314 = vst [vmem:[%s567_s3 + $0x70] sm:$0xff] %v298_v8  ;;  %v291_v15 = vmul.f32 %v367_v13, %v242_v43  ;;  %v299_v16 = vmul.f32 %v375_v14, %v282_v3  ;;  %v144_v17 = vpop.f32.mrb[7].mxu0  ;;  %v176_v18 = vpop.f32.mrb[7].mxu1 }
 0x101   :  { %304 = vst [vmem:[%s567_s3 + $0x20] sm:$0xff] %v288_v11  ;;  %312 = vst [vmem:[%s567_s3 + $0x60] sm:$0xff] %v296_v12  ;;  %v289_v19 = vmul.f32 %v232_v41, %v144_v17  ;;  %v297_v20 = vmul.f32 %v272_v49, %v176_v18 }
 0x102   :  { %307 = vst [vmem:[%s567_s3 + $0x38] sm:$0xff] %v291_v15  ;;  %315 = vst [vmem:[%s567_s3 + $0x78] sm:$0xff] %v299_v16 }
 0x103   :  { %305 = vst [vmem:[%s567_s3 + $0x28] sm:$0xff] %v289_v19  ;;  %313 = vst [vmem:[%s567_s3 + $0x68] sm:$0xff] %v297_v20 }

// kernel: gcl_forward.6
= control target key start
LH: loop header
LB: loop body
LE: loop exit
PB: predicated region body
PF: predicated region fallthrough
CT: control target
= control target key end

     0   :  { %v562_v1 = vmov 0   ;;  %s699_s2 = inlined_call_operand.vmem [shape: bf16[128,128], index: 2, kind: input, shape index: {}]   ;;  %s700_s0 = inlined_call_operand.vmem [shape: s8[128,128], index: 0, kind: input, shape index: {}]   ;;  %s701_s1 = inlined_call_operand.vmem [shape: f32[128,1], index: 1, kind: input, shape index: {}]   ;;  %s702_s3 = inlined_call_operand.vmem [shape: bf16[128,128], index: 3, kind: output, shape index: {}]  }
   0x1   :  { %v554_v0 = vld [vmem:[%s699_s2] sm:$0xff]   ;;  %553 = vset.pattern.permute.xlu1 %v562_v1  ;;  %552 = vset.pattern.permute.xlu0 %v562_v1  ;;  %v555_v2 = vld [vmem:[%s699_s2 + $0x8] sm:$0xff]   ;;  %v556_v3 = vld [vmem:[%s699_s2 + $0x10] sm:$0xff]  }
   0x2   :  { %503 = vmatprep.subr.bf16.mxu0 %v554_v0  ;;  %535 = vmatprep.subr.bf16.mxu1 %v554_v0  ;;  %v557_v4 = vld [vmem:[%s699_s2 + $0x18] sm:$0xff]   ;;  %v598_v5 = vld [vmem:[%s700_s0] sm:$0xff]  ;;  %v603_v6 = vld [vmem:[%s700_s0 + $0x10] sm:$0xff] }
   0x3   :  { %504 = vmatpush3.bf16.msra.mxu0 %v554_v0  ;;  %543 = vmatpush3.bf16.msra.mxu1 %v554_v0  ;;  %v19_v7 = vunpack.c.l.s8.bf16 %v598_v5  ;;  %v23_v8 = vunpack.c.l.s8.bf16 %v603_v6  ;;  %v190_v9 = vld [vmem:[%s701_s1 + $0x10] sm:$0xff]  ;;  %v188_v10 = vld [vmem:[%s701_s1] sm:$0xff]  ;;  %v191_v11 = vld [vmem:[%s701_s1 + $0x18] sm:$0xff]  ;;  %v20_v27 = vunpack.c.h.s8.bf16 %v598_v5  ;;  %v24_v28 = vunpack.c.h.s8.bf16 %v603_v6 }
   0x4   :  { %505 = vmatprep.subr.bf16.mxu0 %v555_v2  ;;  %536 = vmatprep.subr.bf16.mxu1 %v555_v2  ;;  %v189_v12 = vld [vmem:[%s701_s1 + $0x8] sm:$0xff]  ;;  %v558_v13 = vld [vmem:[%s699_s2 + $0x20] sm:$0xff]   ;;  %v195_v17 = vld [vmem:[%s701_s1 + $0x38] sm:$0xff] }
   0x5   :  { %216 = vperm.xlu1 %553, %v190_v9   ;;  %206 = vperm.xlu0 %552, %v188_v10   ;;  %v193_v14 = vld [vmem:[%s701_s1 + $0x28] sm:$0xff]  ;;  %v192_v15 = vld [vmem:[%s701_s1 + $0x20] sm:$0xff]  ;;  %v194_v18 = vld [vmem:[%s701_s1 + $0x30] sm:$0xff] }
   0x6   :  { %519 = vmatprep.mubr.bf16.mxu0 %v19_v7  ;;  %527 = vmatprep.mubr.bf16.mxu1 %v23_v8  ;;  %v559_v16 = vld [vmem:[%s699_s2 + $0x28] sm:$0xff]   ;;  %v560_v19 = vld [vmem:[%s699_s2 + $0x30] sm:$0xff]   ;;  %v196_v21 = vld [vmem:[%s701_s1 + $0x40] sm:$0xff] }
   0x7   :  { %506 = vmatpush3.bf16.msra.mxu0 %v555_v2  ;;  %544 = vmatpush3.bf16.msra.mxu1 %v555_v2  ;;  %v197_v20 = vld [vmem:[%s701_s1 + $0x48] sm:$0xff]  ;;  %v561_v22 = vld [vmem:[%s699_s2 + $0x38] sm:$0xff]   ;;  %v198_v24 = vld [vmem:[%s701_s1 + $0x50] sm:$0xff] }
   0x8   :  { %507 = vmatprep.subr.bf16.mxu0 %v556_v3  ;;  %537 = vmatprep.subr.bf16.mxu1 %v556_v3  ;;  %v199_v23 = vld [vmem:[%s701_s1 + $0x58] sm:$0xff]  ;;  %v16_v25 = vld [vmem:[%s700_s0 + $0x8] sm:$0xff]  ;;  %v200_v32 = vld [vmem:[%s701_s1 + $0x60] sm:$0xff] }
   0x9   :  { %221 = vperm.xlu1 %553, %v191_v11   ;;  %211 = vperm.xlu0 %552, %v189_v12   ;;  %v18_v26 = vld [vmem:[%s700_s0 + $0x18] sm:$0xff]  ;;  %v21_v29 = vunpack.c.l.s8.bf16 %v16_v25  ;;  %v201_v31 = vld [vmem:[%s701_s1 + $0x68] sm:$0xff]  ;;  %v202_v34 = vld [vmem:[%s701_s1 + $0x70] sm:$0xff]  ;;  %v22_v35 = vunpack.c.h.s8.bf16 %v16_v25 }
   0xa   :  { %v25_v30 = vunpack.c.l.s8.bf16 %v18_v26  ;;  %v203_v33 = vld [vmem:[%s701_s1 + $0x78] sm:$0xff]  ;;  %v26_v36 = vunpack.c.h.s8.bf16 %v18_v26 }
   0xb   :  { %508 = vmatpush3.bf16.msra.mxu0 %v556_v3  ;;  %545 = vmatpush3.bf16.msra.mxu1 %v556_v3 }
   0xc   :  { %509 = vmatprep.subr.bf16.mxu0 %v557_v4  ;;  %538 = vmatprep.subr.bf16.mxu1 %v557_v4 }
   0xd   :  { %231 = vperm.xlu1 %553, %v193_v14   ;;  %226 = vperm.xlu0 %552, %v192_v15  }
   0xf   :  { %510 = vmatpush3.bf16.msra.mxu0 %v557_v4  ;;  %546 = vmatpush3.bf16.msra.mxu1 %v557_v4 }
  0x10   :  { %511 = vmatprep.subr.bf16.mxu0 %v558_v13  ;;  %539 = vmatprep.subr.bf16.mxu1 %v558_v13 }
  0x11   :  { %241 = vperm.xlu1 %553, %v195_v17   ;;  %236 = vperm.xlu0 %552, %v194_v18  }
  0x13   :  { %512 = vmatpush3.bf16.msra.mxu0 %v558_v13  ;;  %547 = vmatpush3.bf16.msra.mxu1 %v558_v13 }
  0x14   :  { %513 = vmatprep.subr.bf16.mxu0 %v559_v16  ;;  %540 = vmatprep.subr.bf16.mxu1 %v559_v16 }
  0x15   :  { %251 = vperm.xlu1 %553, %v197_v20   ;;  %246 = vperm.xlu0 %552, %v196_v21  }
  0x17   :  { %514 = vmatpush3.bf16.msra.mxu0 %v559_v16  ;;  %548 = vmatpush3.bf16.msra.mxu1 %v559_v16 }
  0x18   :  { %515 = vmatprep.subr.bf16.mxu0 %v560_v19  ;;  %541 = vmatprep.subr.bf16.mxu1 %v560_v19 }
  0x19   :  { %261 = vperm.xlu1 %553, %v199_v23   ;;  %256 = vperm.xlu0 %552, %v198_v24  }
  0x1b   :  { %516 = vmatpush3.bf16.msra.mxu0 %v560_v19  ;;  %549 = vmatpush3.bf16.msra.mxu1 %v560_v19 }
  0x1c   :  { %517 = vmatprep.subr.bf16.mxu0 %v561_v22  ;;  %542 = vmatprep.subr.bf16.mxu1 %v561_v22 }
  0x1d   :  { %271 = vperm.xlu1 %553, %v201_v31   ;;  %266 = vperm.xlu0 %552, %v200_v32  }
  0x1f   :  { %518 = vmatpush3.bf16.msra.mxu0 %v561_v22  ;;  %550 = vmatpush3.bf16.msra.mxu1 %v561_v22 }
  0x21   :  { %281 = vperm.xlu1 %553, %v203_v33   ;;  %276 = vperm.xlu0 %552, %v202_v34  }
  0x22   :  { %520 = vmatmul.mubr.bf16.vlgmr.msra.gmra.mrb[0].mxu0 %v20_v27  ;;  %528 = vmatmul.mubr.bf16.vlgmr.msra.gmra.mrb[0].mxu1 %v24_v28 }
  0x23   :  { %523 = vmatprep.mubr.bf16.mxu0 %v21_v29  ;;  %531 = vmatprep.mubr.bf16.mxu1 %v25_v30 }
  0x2a   :  { %524 = vmatmul.mubr.bf16.gmra.mrb[4].mxu0 %v22_v35  ;;  %532 = vmatmul.mubr.bf16.gmra.mrb[4].mxu1 %v26_v36 }
  0x84   :  { %v217_v37 = vpop.permute.xlu1 %216  ;;  %v207_v38 = vpop.permute.xlu0 %206 }
  0x88   :  { %v222_v39 = vpop.permute.xlu1 %221  ;;  %v212_v40 = vpop.permute.xlu0 %211 }
  0x8c   :  { %v232_v41 = vpop.permute.xlu1 %231  ;;  %v227_v42 = vpop.permute.xlu0 %226 }
  0x90   :  { %v242_v43 = vpop.permute.xlu1 %241  ;;  %v237_v44 = vpop.permute.xlu0 %236 }
  0x94   :  { %v252_v45 = vpop.permute.xlu1 %251  ;;  %v247_v46 = vpop.permute.xlu0 %246 }
  0x98   :  { %v262_v47 = vpop.permute.xlu1 %261  ;;  %v257_v48 = vpop.permute.xlu0 %256 }
  0x9c   :  { %v272_v49 = vpop.permute.xlu1 %271  ;;  %v267_v50 = vpop.permute.xlu0 %266 }
  0xa0   :  { %v282_v11 = vpop.permute.xlu1 %281  ;;  %v277_v12 = vpop.permute.xlu0 %276 }
  0xf5   :  { %v521_v51 = vpop.f32.mrb[0].mxu0  ;;  %v529_v52 = vpop.f32.mrb[0].mxu1 }
  0xf6   :  { %v286_v53 = vmul.f32 %v521_v51, %v217_v37  ;;  %v294_v54 = vmul.f32 %v529_v52, %v257_v48  ;;  %v125_v55 = vpop.f32.mrb[1].mxu0  ;;  %v157_v56 = vpop.f32.mrb[1].mxu1 }
  0xf7   :  { %v284_v57 = vmul.f32 %v207_v38, %v125_v55  ;;  %v292_v58 = vmul.f32 %v247_v46, %v157_v56  ;;  %v522_v59 = vpop.f32.mrb[2].mxu0  ;;  %v530_v60 = vpop.f32.mrb[2].mxu1 }
  0xf8   :  { %v287_v61 = vmul.f32 %v522_v59, %v222_v39  ;;  %v295_v62 = vmul.f32 %v530_v60, %v262_v47  ;;  %v128_v63 = vpop.f32.mrb[3].mxu0  ;;  %v160_v0 = vpop.f32.mrb[3].mxu1  ;;  %v302_v3 = vmax.f32 %v286_v53, 0.0  ;;  %v310_v4 = vmax.f32 %v294_v54, 0.0 }
  0xf9   :  { %v285_v1 = vmul.f32 %v212_v40, %v128_v63  ;;  %v293_v2 = vmul.f32 %v252_v45, %v160_v0  ;;  %v300_v7 = vmax.f32 %v284_v57, 0.0  ;;  %v308_v8 = vmax.f32 %v292_v58, 0.0 }
  0xfa   :  { %v303_v5 = vmax.f32 %v287_v61, 0.0  ;;  %v311_v6 = vmax.f32 %v295_v62, 0.0 }
  0xfb   :  { %v301_v9 = vmax.f32 %v285_v1, 0.0  ;;  %v309_v10 = vmax.f32 %v293_v2, 0.0 }
  0xfc   :  { %v448_v13 = vpack.c.bf16 %v303_v5, %v302_v3  ;;  %v468_v14 = vpack.c.bf16 %v311_v6, %v310_v4 }
  0xfd   :  { %v443_v15 = vpack.c.bf16 %v301_v9, %v300_v7  ;;  %v463_v16 = vpack.c.bf16 %v309_v10, %v308_v8  ;;  %v525_v17 = vpop.f32.mrb[4].mxu0  ;;  %v533_v18 = vpop.f32.mrb[4].mxu1 }
  0xfe   :  { %480 = vst [vmem:[%s702_s3 + $0x8] sm:$0xff] %v448_v13   ;;  %484 = vst [vmem:[%s702_s3 + $0x28] sm:$0xff] %v468_v14   ;;  %v290_v19 = vmul.f32 %v525_v17, %v237_v44  ;;  %v298_v20 = vmul.f32 %v533_v18, %v277_v12  ;;  %v141_v21 = vpop.f32.mrb[5].mxu0  ;;  %v173_v22 = vpop.f32.mrb[5].mxu1 }
  0xff   :  { %444 = vst [vmem:[%s702_s3] sm:$0xff] %v443_v15   ;;  %483 = vst [vmem:[%s702_s3 + $0x20] sm:$0xff] %v463_v16   ;;  %v288_v23 = vmul.f32 %v227_v42, %v141_v21  ;;  %v296_v24 = vmul.f32 %v267_v50, %v173_v22  ;;  %v526_v25 = vpop.f32.mrb[6].mxu0  ;;  %v534_v26 = vpop.f32.mrb[6].mxu1 }
 0x100   :  { %v291_v27 = vmul.f32 %v526_v25, %v242_v43  ;;  %v299_v28 = vmul.f32 %v534_v26, %v282_v11  ;;  %v144_v29 = vpop.f32.mrb[7].mxu0  ;;  %v176_v30 = vpop.f32.mrb[7].mxu1  ;;  %v306_v33 = vmax.f32 %v290_v19, 0.0  ;;  %v314_v34 = vmax.f32 %v298_v20, 0.0 }
 0x101   :  { %v289_v31 = vmul.f32 %v232_v41, %v144_v29  ;;  %v297_v32 = vmul.f32 %v272_v49, %v176_v30  ;;  %v304_v37 = vmax.f32 %v288_v23, 0.0  ;;  %v312_v38 = vmax.f32 %v296_v24, 0.0 }
 0x102   :  { %v307_v35 = vmax.f32 %v291_v27, 0.0  ;;  %v315_v36 = vmax.f32 %v299_v28, 0.0 }
 0x103   :  { %v305_v39 = vmax.f32 %v289_v31, 0.0  ;;  %v313_v40 = vmax.f32 %v297_v32, 0.0 }
 0x104   :  { %v458_v44 = vpack.c.bf16 %v307_v35, %v306_v33  ;;  %v478_v45 = vpack.c.bf16 %v315_v36, %v314_v34 }
 0x105   :  { %v453_v42 = vpack.c.bf16 %v305_v39, %v304_v37  ;;  %v473_v46 = vpack.c.bf16 %v313_v40, %v312_v38 }
 0x106   :  { %482 = vst [vmem:[%s702_s3 + $0x18] sm:$0xff] %v458_v44   ;;  %486 = vst [vmem:[%s702_s3 + $0x38] sm:$0xff] %v478_v45  }
 0x107   :  { %481 = vst [vmem:[%s702_s3 + $0x10] sm:$0xff] %v453_v42   ;;  %485 = vst [vmem:[%s702_s3 + $0x30] sm:$0xff] %v473_v46  }

// kernel: gcl_forward.9
= control target key start
LH: loop header
LB: loop body
LE: loop exit
PB: predicated region body
PF: predicated region fallthrough
CT: control target
= control target key end

     0   :  { %s878_s1 = inlined_call_operand.vmem [shape: f32[128,128], index: 1, kind: input, shape index: {}]   ;;  %s879_s0 = inlined_call_operand.vmem [shape: f32[128,128], index: 0, kind: input, shape index: {}]   ;;  %s880_s3 = inlined_call_operand.vmem [shape: f32[128,128], index: 3, kind: input, shape index: {}]   ;;  %s881_s2 = inlined_call_operand.vmem [shape: f32[1,128], index: 2, kind: input, shape index: {}]   ;;  %s882_s4 = inlined_call_operand.vmem [shape: f32[1,128], index: 4, kind: input, shape index: {}]   ;;  %s883_s5 = inlined_call_operand.vmem [shape: f32[128,128], index: 5, kind: output, shape index: {}]  }
   0x1   :  { %v36_v0 = vld [vmem:[%s878_s1] sm:$0xff]  ;;  %v37_v1 = vld [vmem:[%s878_s1 + $0x8] sm:$0xff]  ;;  %v38_v2 = vld [vmem:[%s878_s1 + $0x10] sm:$0xff] }
   0x2   :  { %v586_v3 = vpack.c.bf16 %v37_v1, %v36_v0  ;;  %v39_v4 = vld [vmem:[%s878_s1 + $0x18] sm:$0xff]  ;;  %v40_v6 = vld [vmem:[%s878_s1 + $0x20] sm:$0xff]  ;;  %v41_v7 = vld [vmem:[%s878_s1 + $0x28] sm:$0xff] }
   0x3   :  { %v590_v5 = vpack.c.bf16 %v39_v4, %v38_v2  ;;  %v594_v8 = vpack.c.bf16 %v41_v7, %v40_v6  ;;  %v20_v9 = vld [vmem:[%s879_s0] sm:$0xff]  ;;  %v42_v10 = vld [vmem:[%s878_s1 + $0x30] sm:$0xff]  ;;  %v43_v11 = vld [vmem:[%s878_s1 + $0x38] sm:$0xff] }
   0x4   :  { %587 = vmatprep.subr.bf16.mxu0 %v586_v3  ;;  %506 = vmatprep.mubr.f32.mxu0 %v20_v9  ;;  %v598_v12 = vpack.c.bf16 %v43_v11, %v42_v10  ;;  %v44_v13 = vld [vmem:[%s878_s1 + $0x40] sm:$0xff]  ;;  %v45_v14 = vld [vmem:[%s878_s1 + $0x48] sm:$0xff]  ;;  %v222_v17 = vld [vmem:[%s880_s3 + $0x10] sm:$0xff] }
   0x5   :  { %589 = vmatpush3.bf16.msra.mxu0 %v586_v3  ;;  %v220_v15 = vld [vmem:[%s880_s3] sm:$0xff]  ;;  %v221_v16 = vld [vmem:[%s880_s3 + $0x8] sm:$0xff]  ;;  %v223_v18 = vld [vmem:[%s880_s3 + $0x18] sm:$0xff]  ;;  %v602_v21 = vpack.c.bf16 %v45_v14, %v44_v13 }
   0x6   :  { %591 = vmatprep.subr.bf16.mxu0 %v590_v5  ;;  %v618_v19 = vpack.c.bf16 %v221_v16, %v220_v15  ;;  %v622_v20 = vpack.c.bf16 %v223_v18, %v222_v17  ;;  %v224_v22 = vld [vmem:[%s880_s3 + $0x20] sm:$0xff]  ;;  %v225_v23 = vld [vmem:[%s880_s3 + $0x28] sm:$0xff]  ;;  %v46_v24 = vld [vmem:[%s878_s1 + $0x50] sm:$0xff] }
   0x7   :  { %v47_v25 = vld [vmem:[%s878_s1 + $0x58] sm:$0xff]  ;;  %v626_v26 = vpack.c.bf16 %v225_v23, %v224_v22  ;;  %v226_v28 = vld [vmem:[%s880_s3 + $0x30] sm:$0xff]  ;;  %v48_v30 = vld [vmem:[%s878_s1 + $0x60] sm:$0xff] }
   0x8   :  { %619 = vmatprep.subr.bf16.mxu1 %v618_v19  ;;  %v606_v27 = vpack.c.bf16 %v47_v25, %v46_v24  ;;  %v227_v29 = vld [vmem:[%s880_s3 + $0x38] sm:$0xff]  ;;  %v49_v31 = vld [vmem:[%s878_s1 + $0x68] sm:$0xff]  ;;  %v228_v34 = vld [vmem:[%s880_s3 + $0x40] sm:$0xff] }
   0x9   :  { %593 = vmatpush3.bf16.msra.mxu0 %v590_v5  ;;  %621 = vmatpush3.bf16.msra.mxu1 %v618_v19  ;;  %v630_v32 = vpack.c.bf16 %v227_v29, %v226_v28  ;;  %v610_v33 = vpack.c.bf16 %v49_v31, %v48_v30  ;;  %v229_v35 = vld [vmem:[%s880_s3 + $0x48] sm:$0xff]  ;;  %v50_v36 = vld [vmem:[%s878_s1 + $0x70] sm:$0xff]  ;;  %v51_v37 = vld [vmem:[%s878_s1 + $0x78] sm:$0xff] }
   0xa   :  { %595 = vmatprep.subr.bf16.mxu0 %v594_v8  ;;  %623 = vmatprep.subr.bf16.mxu1 %v622_v20  ;;  %v634_v38 = vpack.c.bf16 %v229_v35, %v228_v34  ;;  %v614_v39 = vpack.c.bf16 %v51_v37, %v50_v36  ;;  %v230_v40 = vld [vmem:[%s880_s3 + $0x50] sm:$0xff]  ;;  %v231_v41 = vld [vmem:[%s880_s3 + $0x58] sm:$0xff]  ;;  %v232_v43 = vld [vmem:[%s880_s3 + $0x60] sm:$0xff] }
   0xb   :  { %v638_v42 = vpack.c.bf16 %v231_v41, %v230_v40  ;;  %v233_v44 = vld [vmem:[%s880_s3 + $0x68] sm:$0xff]  ;;  %v22_v47 = vld [vmem:[%s879_s0 + $0x10] sm:$0xff]  ;;  %v23_v48 = vld [vmem:[%s879_s0 + $0x18] sm:$0xff] }
   0xc   :  { %v21_v45 = vld [vmem:[%s879_s0 + $0x8] sm:$0xff]  ;;  %v642_v46 = vpack.c.bf16 %v233_v44, %v232_v43  ;;  %v24_v49 = vld [vmem:[%s879_s0 + $0x20] sm:$0xff]  ;;  %v26_v51 = vld [vmem:[%s879_s0 + $0x30] sm:$0xff] }
   0xd   :  { %597 = vmatpush3.bf16.msra.mxu0 %v594_v8  ;;  %625 = vmatpush3.bf16.msra.mxu1 %v622_v20  ;;  %v25_v50 = vld [vmem:[%s879_s0 + $0x28] sm:$0xff]  ;;  %v27_v52 = vld [vmem:[%s879_s0 + $0x38] sm:$0xff]  ;;  %v28_v53 = vld [vmem:[%s879_s0 + $0x40] sm:$0xff] }
   0xe   :  { %599 = vmatprep.subr.bf16.mxu0 %v598_v12  ;;  %627 = vmatprep.subr.bf16.mxu1 %v626_v26  ;;  %v29_v54 = vld [vmem:[%s879_s0 + $0x48] sm:$0xff]  ;;  %v30_v55 = vld [vmem:[%s879_s0 + $0x50] sm:$0xff]  ;;  %v31_v56 = vld [vmem:[%s879_s0 + $0x58] sm:$0xff] }
   0xf   :  { %v32_v57 = vld [vmem:[%s879_s0 + $0x60] sm:$0xff]  ;;  %v33_v58 = vld [vmem:[%s879_s0 + $0x68] sm:$0xff]  ;;  %v34_v59 = vld [vmem:[%s879_s0 + $0x70] sm:$0xff] }
  0x10   :  { %v35_v60 = vld [vmem:[%s879_s0 + $0x78] sm:$0xff]  ;;  %v234_v61 = vld [vmem:[%s880_s3 + $0x70] sm:$0xff]  ;;  %v408_v0 = vld [vmem:[%s881_s2] ss:$0 sm:$0xff] }
  0x11   :  { %601 = vmatpush3.bf16.msra.mxu0 %v598_v12  ;;  %629 = vmatpush3.bf16.msra.mxu1 %v626_v26  ;;  %v235_v62 = vld [vmem:[%s880_s3 + $0x78] sm:$0xff] }
  0x12   :  { %603 = vmatprep.subr.bf16.mxu0 %v602_v21  ;;  %631 = vmatprep.subr.bf16.mxu1 %v630_v32  ;;  %v646_v63 = vpack.c.bf16 %v235_v62, %v234_v61 }
  0x15   :  { %605 = vmatpush3.bf16.msra.mxu0 %v602_v21  ;;  %633 = vmatpush3.bf16.msra.mxu1 %v630_v32 }
  0x16   :  { %607 = vmatprep.subr.bf16.mxu0 %v606_v27  ;;  %635 = vmatprep.subr.bf16.mxu1 %v634_v38 }
  0x19   :  { %609 = vmatpush3.bf16.msra.mxu0 %v606_v27  ;;  %637 = vmatpush3.bf16.msra.mxu1 %v634_v38 }
  0x1a   :  { %611 = vmatprep.subr.bf16.mxu0 %v610_v33  ;;  %639 = vmatprep.subr.bf16.mxu1 %v638_v42 }
  0x1d   :  { %613 = vmatpush3.bf16.msra.mxu0 %v610_v33  ;;  %641 = vmatpush3.bf16.msra.mxu1 %v638_v42 }
  0x1e   :  { %615 = vmatprep.subr.bf16.mxu0 %v614_v39  ;;  %643 = vmatprep.subr.bf16.mxu1 %v642_v46 }
  0x21   :  { %617 = vmatpush3.bf16.msra.mxu0 %v614_v39  ;;  %645 = vmatpush3.bf16.msra.mxu1 %v642_v46 }
  0x22   :  { %647 = vmatprep.subr.bf16.mxu1 %v646_v63 }
  0x24   :  { %507 = vmatmul.mubr.f32.vlgmr.msra.gmra.mrb[0].mxu0 %v21_v45 }
  0x25   :  { %509 = vmatprep.mubr.f32.mxu0 %v22_v47  ;;  %649 = vmatpush3.bf16.msra.mxu1 %v646_v63 }
  0x28   :  { %510 = vmatmul.mubr.f32.gmra.mrb[2].mxu0 %v23_v48 }
  0x29   :  { %512 = vmatprep.mubr.f32.mxu0 %v24_v49  ;;  %v409_v49 = vld [vmem:[%s882_s4] ss:$0 sm:$0xff] }
  0x2c   :  { %513 = vmatmul.mubr.f32.gmra.mrb[4].mxu0 %v25_v50 }
  0x2d   :  { %515 = vmatprep.mubr.f32.mxu0 %v26_v51 }
  0x30   :  { %516 = vmatmul.mubr.f32.gmra.mrb[6].mxu0 %v27_v52 }
  0x31   :  { %518 = vmatprep.mubr.f32.mxu0 %v28_v53 }
  0x34   :  { %519 = vmatmul.mubr.f32.gmra.mrb[8].mxu0 %v29_v54 }
  0x35   :  { %521 = vmatprep.mubr.f32.mxu0 %v30_v55 }
  0x38   :  { %522 = vmatmul.mubr.f32.gmra.mrb[10].mxu0 %v31_v56 }
  0x39   :  { %524 = vmatprep.mubr.f32.mxu0 %v32_v57 }
  0x3c   :  { %525 = vmatmul.mubr.f32.gmra.mrb[12].mxu0 %v33_v58 }
  0x3d   :  { %527 = vmatprep.mubr.f32.mxu0 %v34_v59 }
  0x40   :  { %528 = vmatmul.mubr.f32.gmra.mrb[14].mxu0 %v35_v60 }
  0xf7   :  { %v508_v1 = vpop.f32.mrb[0].mxu0 }
  0xf8   :  { %v131_v2 = vadd.f32 %v508_v1, %v408_v0  ;;  %v125_v3 = vpop.f32.mrb[1].mxu0 }
  0xf9   :  { %v126_v4 = vadd.f32 %v408_v0, %v125_v3 }
  0xfa   :  { %v205_v7 = vmax.f32 %v131_v2, 0.0 }
  0xfb   :  { %v511_v5 = vpop.f32.mrb[2].mxu0  ;;  %v204_v6 = vmax.f32 %v126_v4, 0.0 }
  0xfc   :  { %v141_v8 = vadd.f32 %v511_v5, %v408_v0  ;;  %v135_v9 = vpop.f32.mrb[3].mxu0 }
  0xfd   :  { %v136_v10 = vadd.f32 %v408_v0, %v135_v9  ;;  %562 = vmatprep.mubr.f32.mxu1 %v204_v6 }
  0xfe   :  { %563 = vmatmul.mubr.f32.vlgmr.msra.gmra.mrb[0].mxu1 %v205_v7  ;;  %v207_v13 = vmax.f32 %v141_v8, 0.0 }
  0xff   :  { %v206_v11 = vmax.f32 %v136_v10, 0.0  ;;  %v514_v12 = vpop.f32.mrb[4].mxu0 }
 0x100   :  { %v151_v14 = vadd.f32 %v514_v12, %v408_v0  ;;  %v145_v15 = vpop.f32.mrb[5].mxu0 }
 0x101   :  { %v146_v16 = vadd.f32 %v408_v0, %v145_v15  ;;  %565 = vmatprep.mubr.f32.mxu1 %v206_v11 }
 0x102   :  { %566 = vmatmul.mubr.f32.gmra.mrb[2].mxu1 %v207_v13  ;;  %v209_v19 = vmax.f32 %v151_v14, 0.0 }
 0x103   :  { %v208_v17 = vmax.f32 %v146_v16, 0.0  ;;  %v517_v18 = vpop.f32.mrb[6].mxu0 }
 0x104   :  { %v161_v20 = vadd.f32 %v517_v18, %v408_v0  ;;  %v155_v21 = vpop.f32.mrb[7].mxu0 }
 0x105   :  { %v156_v22 = vadd.f32 %v408_v0, %v155_v21  ;;  %568 = vmatprep.mubr.f32.mxu1 %v208_v17 }
 0x106   :  { %569 = vmatmul.mubr.f32.gmra.mrb[4].mxu1 %v209_v19  ;;  %v211_v25 = vmax.f32 %v161_v20, 0.0 }
 0x107   :  { %v210_v23 = vmax.f32 %v156_v22, 0.0  ;;  %v520_v24 = vpop.f32.mrb[8].mxu0 }
 0x108   :  { %v171_v26 = vadd.f32 %v520_v24, %v408_v0  ;;  %v165_v27 = vpop.f32.mrb[9].mxu0 }
 0x109   :  { %v166_v28 = vadd.f32 %v408_v0, %v165_v27  ;;  %571 = vmatprep.mubr.f32.mxu1 %v210_v23 }
 0x10a   :  { %572 = vmatmul.mubr.f32.gmra.mrb[6].mxu1 %v211_v25  ;;  %v213_v31 = vmax.f32 %v171_v26, 0.0 }
 0x10b   :  { %v212_v29 = vmax.f32 %v166_v28, 0.0  ;;  %v523_v30 = vpop.f32.mrb[10].mxu0 }
 0x10c   :  { %v181_v32 = vadd.f32 %v523_v30, %v408_v0  ;;  %v175_v33 = vpop.f32.mrb[11].mxu0 }
 0x10d   :  { %v176_v34 = vadd.f32 %v408_v0, %v175_v33  ;;  %574 = vmatprep.mubr.f32.mxu1 %v212_v29 }
 0x10e   :  { %575 = vmatmul.mubr.f32.gmra.mrb[8].mxu1 %v213_v31  ;;  %v215_v37 = vmax.f32 %v181_v32, 0.0 }
 0x10f   :  { %v214_v35 = vmax.f32 %v176_v34, 0.0  ;;  %v526_v36 = vpop.f32.mrb[12].mxu0 }
 0x110   :  { %v191_v38 = vadd.f32 %v526_v36, %v408_v0  ;;  %v185_v39 = vpop.f32.mrb[13].mxu0 }
 0x111   :  { %v186_v40 = vadd.f32 %v408_v0, %v185_v39  ;;  %577 = vmatprep.mubr.f32.mxu1 %v214_v35 }
 0x112   :  { %578 = vmatmul.mubr.f32.gmra.mrb[10].mxu1 %v215_v37  ;;  %v217_v43 = vmax.f32 %v191_v38, 0.0 }
 0x113   :  { %v216_v41 = vmax.f32 %v186_v40, 0.0  ;;  %v529_v42 = vpop.f32.mrb[14].mxu0 }
 0x114   :  { %v201_v44 = vadd.f32 %v529_v42, %v408_v0  ;;  %v195_v45 = vpop.f32.mrb[15].mxu0 }
 0x115   :  { %v196_v46 = vadd.f32 %v408_v0, %v195_v45  ;;  %580 = vmatprep.mubr.f32.mxu1 %v216_v41 }
 0x116   :  { %581 = vmatmul.mubr.f32.gmra.mrb[12].mxu1 %v217_v43  ;;  %v219_v48 = vmax.f32 %v201_v44, 0.0 }
 0x117   :  { %v218_v47 = vmax.f32 %v196_v46, 0.0 }
 0x119   :  { %583 = vmatprep.mubr.f32.mxu1 %v218_v47 }
 0x11a   :  { %584 = vmatmul.mubr.f32.gmra.mrb[14].mxu1 %v219_v48 }
 0x1d1   :  { %v564_v50 = vpop.f32.mrb[0].mxu1 }
 0x1d2   :  { %v315_v51 = vadd.f32 %v564_v50, %v409_v49  ;;  %v309_v52 = vpop.f32.mrb[1].mxu1 }
 0x1d3   :  { %v310_v53 = vadd.f32 %v409_v49, %v309_v52 }
 0x1d4   :  { %389 = vst [vmem:[%s883_s5 + $0x8] sm:$0xff] %v315_v51 }
 0x1d5   :  { %388 = vst [vmem:[%s883_s5] sm:$0xff] %v310_v53  ;;  %v567_v54 = vpop.f32.mrb[2].mxu1 }
 0x1d6   :  { %v325_v55 = vadd.f32 %v567_v54, %v409_v49  ;;  %v319_v56 = vpop.f32.mrb[3].mxu1 }
 0x1d7   :  { %v320_v57 = vadd.f32 %v409_v49, %v319_v56 }
 0x1d8   :  { %391 = vst [vmem:[%s883_s5 + $0x18] sm:$0xff] %v325_v55 }
 0x1d9   :  { %390 = vst [vmem:[%s883_s5 + $0x10] sm:$0xff] %v320_v57  ;;  %v570_v58 = vpop.f32.mrb[4].mxu1 }
 0x1da   :  { %v335_v59 = vadd.f32 %v570_v58, %v409_v49  ;;  %v329_v60 = vpop.f32.mrb[5].mxu1 }
 0x1db   :  { %v330_v61 = vadd.f32 %v409_v49, %v329_v60 }
 0x1dc   :  { %393 = vst [vmem:[%s883_s5 + $0x28] sm:$0xff] %v335_v59 }
 0x1dd   :  { %392 = vst [vmem:[%s883_s5 + $0x20] sm:$0xff] %v330_v61  ;;  %v573_v62 = vpop.f32.mrb[6].mxu1 }
 0x1de   :  { %v345_v63 = vadd.f32 %v573_v62, %v409_v49  ;;  %v339_v0 = vpop.f32.mrb[7].mxu1 }
 0x1df   :  { %v340_v1 = vadd.f32 %v409_v49, %v339_v0 }
 0x1e0   :  { %395 = vst [vmem:[%s883_s5 + $0x38] sm:$0xff] %v345_v63 }
 0x1e1   :  { %394 = vst [vmem:[%s883_s5 + $0x30] sm:$0xff] %v340_v1  ;;  %v576_v2 = vpop.f32.mrb[8].mxu1 }
 0x1e2   :  { %v355_v3 = vadd.f32 %v576_v2, %v409_v49  ;;  %v349_v4 = vpop.f32.mrb[9].mxu1 }
 0x1e3   :  { %v350_v5 = vadd.f32 %v409_v49, %v349_v4 }
 0x1e4   :  { %397 = vst [vmem:[%s883_s5 + $0x48] sm:$0xff] %v355_v3 }
 0x1e5   :  { %396 = vst [vmem:[%s883_s5 + $0x40] sm:$0xff] %v350_v5  ;;  %v579_v6 = vpop.f32.mrb[10].mxu1 }
 0x1e6   :  { %v365_v7 = vadd.f32 %v579_v6, %v409_v49  ;;  %v359_v8 = vpop.f32.mrb[11].mxu1 }
 0x1e7   :  { %v360_v9 = vadd.f32 %v409_v49, %v359_v8 }
 0x1e8   :  { %399 = vst [vmem:[%s883_s5 + $0x58] sm:$0xff] %v365_v7 }
 0x1e9   :  { %398 = vst [vmem:[%s883_s5 + $0x50] sm:$0xff] %v360_v9  ;;  %v582_v10 = vpop.f32.mrb[12].mxu1 }
 0x1ea   :  { %v375_v11 = vadd.f32 %v582_v10, %v409_v49  ;;  %v369_v12 = vpop.f32.mrb[13].mxu1 }
 0x1eb   :  { %v370_v13 = vadd.f32 %v409_v49, %v369_v12 }
 0x1ec   :  { %401 = vst [vmem:[%s883_s5 + $0x68] sm:$0xff] %v375_v11 }
 0x1ed   :  { %400 = vst [vmem:[%s883_s5 + $0x60] sm:$0xff] %v370_v13  ;;  %v585_v14 = vpop.f32.mrb[14].mxu1 }
 0x1ee   :  { %v385_v15 = vadd.f32 %v585_v14, %v409_v49  ;;  %v379_v16 = vpop.f32.mrb[15].mxu1 }
 0x1ef   :  { %v380_v17 = vadd.f32 %v409_v49, %v379_v16 }
 0x1f0   :  { %403 = vst [vmem:[%s883_s5 + $0x78] sm:$0xff] %v385_v15 }
 0x1f1   :  { %402 = vst [vmem:[%s883_s5 + $0x70] sm:$0xff] %v380_v17 }

</bundles_post_ra>
